<compile_context>
chip_gen: v7x
topology: tpu7x:2x2x1
jax: 0.10.0
libtpu: 0.0.40
codegen_flags: <defaults>
</compile_context>

<pallas_src>
import functools

import jax
import jax.numpy as jnp
from jax.experimental import pallas as pl
from jax.experimental.pallas import tpu as pltpu

LANE = 128
SUBLANE = 8


def _round_up(n, m):
    return ((n + m - 1) // m) * m


def _encode_last_kernel(x_ref, w_mulv_ref, b_mulv_ref, w_emb_ref, b_emb_ref,
                        noise_ref, mu_ref, lv_ref, emb_ref, *, p_out):
    # x arrives in its original dtype (usually f32); cast to bf16 in-kernel so
    # the wrapper never materializes a separate cast pass through HBM.
    x = x_ref[...].astype(jnp.bfloat16)

    # Fused mu || log_var projection: ONE MXU matmul (bf16 operands, f32 acc).
    mulv = jnp.dot(x, w_mulv_ref[...],
                   preferred_element_type=jnp.float32) + b_mulv_ref[...]
    mu = mulv[:, :p_out]          # lane-aligned static split (p_out % 128 == 0)
    lv = mulv[:, p_out:]

    # Reparameterization trick, f32 on VPU/EUP: z = mu + eps * exp(log_var/2).
    std = jnp.exp(lv * 0.5)
    z = mu + noise_ref[...].astype(jnp.float32) * std

    # Embedding projection (bf16 MXU operands, f32 accumulation).
    emb = jnp.dot(z.astype(w_emb_ref.dtype), w_emb_ref[...],
                  preferred_element_type=jnp.float32) + b_emb_ref[...]

    # Lane-dense (multiple-of-128) unmasked stores; output dtypes set by caller.
    mu_ref[...] = mu.astype(mu_ref.dtype)
    lv_ref[...] = lv.astype(lv_ref.dtype)
    emb_ref[...] = emb.astype(emb_ref.dtype)


def init_params(key, size, output_size):
    """f32 params matching nn.Linear shapes (weights stored [in, out])."""
    ks = jax.random.split(key, 6)

    def lin(kw, kb, fan_in, fan_out):
        bound = 1.0 / jnp.sqrt(fan_in)
        w = jax.random.uniform(kw, (fan_in, fan_out), jnp.float32, -bound, bound)
        b = jax.random.uniform(kb, (1, fan_out), jnp.float32, -bound, bound)
        return w, b

    w_mu, b_mu = lin(ks[0], ks[1], size, output_size)
    w_lv, b_lv = lin(ks[2], ks[3], size, output_size)
    w_emb, b_emb = lin(ks[4], ks[5], output_size, size - 4)
    return dict(w_mu=w_mu, b_mu=b_mu, w_lv=w_lv, b_lv=b_lv,
                w_emb=w_emb, b_emb=b_emb)


def pack_params(params, size, output_size):
    """Fuse + zero-pad weights for the kernel (done once at setup)."""
    emb_out = size - 4
    p_out = _round_up(output_size, LANE)
    p_emb = _round_up(emb_out, LANE)

    def pad_cols(a, cols):
        return jnp.pad(a, ((0, 0), (0, cols - a.shape[1])))

    # Fused mu||log_var weight: [size, 2*p_out], bf16 for the MXU.
    w_mulv = jnp.concatenate(
        [pad_cols(params["w_mu"], p_out), pad_cols(params["w_lv"], p_out)],
        axis=1).astype(jnp.bfloat16)
    # Biases stay f32 (added after the f32 accumulation).
    b_mulv = jnp.concatenate(
        [pad_cols(params["b_mu"], p_out), pad_cols(params["b_lv"], p_out)],
        axis=1)

    # Emb weight padded on both dims; padded rows are zero so padded lanes of z
    # cannot leak into emb.
    w_emb = jnp.pad(params["w_emb"],
                    ((0, p_out - output_size), (0, p_emb - emb_out))
                    ).astype(jnp.bfloat16)
    b_emb = pad_cols(params["b_emb"], p_emb)

    return dict(w_mulv=w_mulv, b_mulv=b_mulv, w_emb=w_emb, b_emb=b_emb,
                size=size, output_size=output_size, emb_out=emb_out,
                p_out=p_out, p_emb=p_emb)


def _choose_tile_b(B, max_tile=512):
    """Balanced batch tiles: <= max_tile rows, >= 2 grid steps whenever the
    batch allows it (v7x has 2 TensorCores; a 1-step grid idles one), tiles
    sized evenly so a ragged batch never wastes a whole extra tile."""
    b8 = _round_up(max(B, 1), SUBLANE)
    if b8 <= SUBLANE:
        return SUBLANE
    n_tiles = max(2, pl.cdiv(b8, max_tile))
    return min(_round_up(pl.cdiv(b8, n_tiles), SUBLANE), b8)


def encode_last(x, packed, noise, *, tile_b=None,
                stats_dtype=jnp.float32, emb_dtype=jnp.bfloat16):
    """x: [B, size]; noise: [B, output_size] (bf16 ok). Returns (emb, mu, log_var)."""
    B, size = x.shape
    assert size == packed["size"]
    output_size = packed["output_size"]
    emb_out = packed["emb_out"]
    p_out = packed["p_out"]
    p_emb = packed["p_emb"]

    if tile_b is None:
        tile_b = _choose_tile_b(B)
    b_pad = _round_up(B, tile_b)

    # Pad batch rows only when needed.  No dtype cast of x here: the bf16 cast
    # happens in-kernel (saves a separate HBM read+write pass).
    x_p = x if b_pad == B else jnp.pad(x, ((0, b_pad - B), (0, 0)))
    if noise.shape == (b_pad, p_out):
        noise_p = noise                       # caller already padded: fast path
    else:
        assert noise.shape == (B, output_size)
        noise_p = jnp.pad(noise, ((0, b_pad - B), (0, p_out - output_size)))

    stats_bytes = jnp.dtype(stats_dtype).itemsize
    emb_bytes = jnp.dtype(emb_dtype).itemsize

    # VMEM budget: streamed tiles are double-buffered by the pipeline, the
    # resident (Buffered(1)) weights are not.
    stream_bytes = tile_b * (size * x_p.dtype.itemsize
                             + p_out * noise_p.dtype.itemsize
                             + 2 * p_out * stats_bytes
                             + p_emb * emb_bytes)
    weight_bytes = (packed["w_mulv"].size * 2 + packed["w_emb"].size * 2
                    + packed["b_mulv"].size * 4 + packed["b_emb"].size * 4)
    vmem_limit = int(max(32 << 20,
                         min(2 * stream_bytes + weight_bytes + (4 << 20),
                             64 << 20)))
    # TODO(synk): at large model dims (size/output_size in the thousands) the
    # resident weights outgrow v7x's 64 MiB VMEM; add a K(size)-axis grid split
    # with an f32 accumulator scratch (and optionally fp8 weights) instead of
    # keeping full weights resident.

    cost = pl.CostEstimate(
        flops=2 * b_pad * (size * 2 * p_out + p_out * p_emb),
        transcendentals=b_pad * p_out,
        bytes_accessed=int(x_p.size * x_p.dtype.itemsize
                           + noise_p.size * noise_p.dtype.itemsize
                           + weight_bytes
                           + b_pad * (2 * p_out * stats_bytes
                                      + p_emb * emb_bytes)),
    )

    kernel = functools.partial(_encode_last_kernel, p_out=p_out)

    mu_pad, lv_pad, emb_pad = pl.pallas_call(
        kernel,
        out_shape=(
            jax.ShapeDtypeStruct((b_pad, p_out), stats_dtype),   # mu
            jax.ShapeDtypeStruct((b_pad, p_out), stats_dtype),   # log_var
            jax.ShapeDtypeStruct((b_pad, p_emb), emb_dtype),     # emb
        ),
        grid_spec=pltpu.PrefetchScalarGridSpec(
            num_scalar_prefetch=0,
            grid=(b_pad // tile_b,),
            in_specs=[
                pl.BlockSpec((tile_b, size), lambda i: (i, 0)),         # x (blocked)
                pl.BlockSpec((size, 2 * p_out), lambda i: (0, 0),       # W_mu||W_lv
                             pipeline_mode=pl.Buffered(1)),             #  (resident)
                pl.BlockSpec((1, 2 * p_out), lambda i: (0, 0),          # b_mu||b_lv
                             pipeline_mode=pl.Buffered(1)),
                pl.BlockSpec((p_out, p_emb), lambda i: (0, 0),          # W_emb
                             pipeline_mode=pl.Buffered(1)),
                pl.BlockSpec((1, p_emb), lambda i: (0, 0),              # b_emb
                             pipeline_mode=pl.Buffered(1)),
                pl.BlockSpec((tile_b, p_out), lambda i: (i, 0)),        # noise (blocked)
            ],
            out_specs=(
                pl.BlockSpec((tile_b, p_out), lambda i: (i, 0)),        # mu slab
                pl.BlockSpec((tile_b, p_out), lambda i: (i, 0)),        # log_var slab
                pl.BlockSpec((tile_b, p_emb), lambda i: (i, 0)),        # emb slab
            ),
        ),
        compiler_params=pltpu.CompilerParams(
            dimension_semantics=("parallel",),
            vmem_limit_bytes=vmem_limit),
        cost_estimate=cost,
    )(x_p, packed["w_mulv"], packed["b_mulv"], packed["w_emb"],
      packed["b_emb"], noise_p)

    # Contiguous prefix slices back to the exact module shapes.
    emb = emb_pad[:B, :emb_out]
    mu = mu_pad[:B, :output_size]
    log_var = lv_pad[:B, :output_size]
    return emb, mu, log_var


def reference(x, params, noise):
    mu = x @ params["w_mu"] + params["b_mu"]
    lv = x @ params["w_lv"] + params["b_lv"]
    z = mu + noise * jnp.exp(lv / 2.0)
    emb = z @ params["w_emb"] + params["b_emb"]
    return emb, mu, lv


if __name__ == "__main__":
    key = jax.random.PRNGKey(0)
    k_param, k_x, k_noise = jax.random.split(key, 3)

    B, size, output_size = 8, 32, 16
    params = init_params(k_param, size, output_size)
    packed = pack_params(params, size, output_size)

    x = jax.random.normal(k_x, (B, size), jnp.float32)
    # torch.randn_like(std) equivalent, drawn deterministically outside; kept
    # in bf16 so the kernel's noise read stream is half-width (the reference
    # consumes the exact same bf16 values upcast to f32).
    noise = jax.random.normal(k_noise, (B, output_size),
                              jnp.float32).astype(jnp.bfloat16)

    emb, mu, log_var = jax.block_until_ready(encode_last(x, packed, noise))

    emb_r, mu_r, lv_r = reference(x, params, noise.astype(jnp.float32))
    assert emb.shape == (B, size - 4)
    assert mu.shape == (B, output_size)
    assert log_var.shape == (B, output_size)
    # bf16 MXU operands / bf16 emb output -> relaxed tolerance vs f32 reference.
    assert jnp.allclose(mu, mu_r, atol=5e-2, rtol=5e-2), "mu mismatch"
    assert jnp.allclose(log_var, lv_r, atol=5e-2, rtol=5e-2), "log_var mismatch"
    assert jnp.allclose(emb.astype(jnp.float32), emb_r,
                        atol=5e-2, rtol=5e-2), "emb mismatch"

    print("KERNEL_OK")
</pallas_src>

<mosaic_0001>
module attributes {stable_mosaic.version = 11 : i64} {
  func.func @_encode_last_kernel(%arg0: i32, %arg1: memref<8x32xf32, #tpu.memory_space<vmem>>, %arg2: memref<32x256xbf16, #tpu.memory_space<vmem>>, %arg3: memref<1x256xf32, #tpu.memory_space<vmem>>, %arg4: memref<128x128xbf16, #tpu.memory_space<vmem>>, %arg5: memref<1x128xf32, #tpu.memory_space<vmem>>, %arg6: memref<8x128xbf16, #tpu.memory_space<vmem>>, %arg7: memref<8x128xf32, #tpu.memory_space<vmem>>, %arg8: memref<8x128xf32, #tpu.memory_space<vmem>>, %arg9: memref<8x128xbf16, #tpu.memory_space<vmem>>) attributes {dimension_semantics = [#tpu.dimension_semantics<parallel>], iteration_bounds = array<i64: 1>, scalar_prefetch = 0 : i64, scratch_operands = 0 : i64, tpu.core_type = #tpu.core_type<tc>, window_params = [{transform_indices = @transform_0, window_bounds = array<i64: 8, 32>}, {pipeline_mode = #tpu.pipeline_mode<synchronous>, transform_indices = @transform_1, window_bounds = array<i64: 32, 256>}, {pipeline_mode = #tpu.pipeline_mode<synchronous>, transform_indices = @transform_2, window_bounds = array<i64: 1, 256>}, {pipeline_mode = #tpu.pipeline_mode<synchronous>, transform_indices = @transform_3, window_bounds = array<i64: 128, 128>}, {pipeline_mode = #tpu.pipeline_mode<synchronous>, transform_indices = @transform_4, window_bounds = array<i64: 1, 128>}, {transform_indices = @transform_5, window_bounds = array<i64: 8, 128>}, {transform_indices = @transform_6, window_bounds = array<i64: 8, 128>}, {transform_indices = @transform_7, window_bounds = array<i64: 8, 128>}, {transform_indices = @transform_8, window_bounds = array<i64: 8, 128>}]} {
    %c0 = arith.constant 0 : index
    %c0_0 = arith.constant 0 : index
    %0 = vector.load %arg1[%c0, %c0_0] : memref<8x32xf32, #tpu.memory_space<vmem>>, vector<8x32xf32>
    %1 = arith.truncf %0 : vector<8x32xf32> to vector<8x32xbf16>
    %c0_1 = arith.constant 0 : index
    %c0_2 = arith.constant 0 : index
    %2 = vector.load %arg2[%c0_1, %c0_2] : memref<32x256xbf16, #tpu.memory_space<vmem>>, vector<32x256xbf16>
    %cst = arith.constant dense<0.000000e+00> : vector<8x256xf32>
    %3 = tpu.matmul %1, %2, %cst {dimension_numbers = #tpu.dot_dimension_numbers<[1], [0], [0], [1], [0, 0, 1, 1], [], []>} : vector<8x32xbf16>, vector<32x256xbf16>, vector<8x256xf32> -> vector<8x256xf32>
    %c0_3 = arith.constant 0 : index
    %c0_4 = arith.constant 0 : index
    %4 = vector.load %arg3[%c0_3, %c0_4] : memref<1x256xf32, #tpu.memory_space<vmem>>, vector<1x256xf32>
    %5 = vector.broadcast %4 : vector<1x256xf32> to vector<8x256xf32>
    %6 = arith.addf %3, %5 : vector<8x256xf32>
    %7 = vector.extract_strided_slice %6 {offsets = [0, 0], sizes = [8, 128], strides = [1, 1]} : vector<8x256xf32> to vector<8x128xf32>
    %8 = vector.extract_strided_slice %6 {offsets = [0, 128], sizes = [8, 128], strides = [1, 1]} : vector<8x256xf32> to vector<8x128xf32>
    %cst_5 = arith.constant 5.000000e-01 : f32
    %9 = vector.broadcast %cst_5 : f32 to vector<8x128xf32>
    %10 = arith.mulf %8, %9 : vector<8x128xf32>
    %11 = math.exp %10 : vector<8x128xf32>
    %c0_6 = arith.constant 0 : index
    %c0_7 = arith.constant 0 : index
    %12 = vector.load %arg6[%c0_6, %c0_7] : memref<8x128xbf16, #tpu.memory_space<vmem>>, vector<8x128xbf16>
    %13 = arith.extf %12 : vector<8x128xbf16> to vector<8x128xf32>
    %14 = arith.mulf %13, %11 : vector<8x128xf32>
    %15 = arith.addf %7, %14 : vector<8x128xf32>
    %16 = arith.truncf %15 : vector<8x128xf32> to vector<8x128xbf16>
    %c0_8 = arith.constant 0 : index
    %c0_9 = arith.constant 0 : index
    %17 = vector.load %arg4[%c0_8, %c0_9] : memref<128x128xbf16, #tpu.memory_space<vmem>>, vector<128x128xbf16>
    %cst_10 = arith.constant dense<0.000000e+00> : vector<8x128xf32>
    %18 = tpu.matmul %16, %17, %cst_10 {dimension_numbers = #tpu.dot_dimension_numbers<[1], [0], [0], [1], [0, 0, 1, 1], [], []>} : vector<8x128xbf16>, vector<128x128xbf16>, vector<8x128xf32> -> vector<8x128xf32>
    %c0_11 = arith.constant 0 : index
    %c0_12 = arith.constant 0 : index
    %19 = vector.load %arg5[%c0_11, %c0_12] : memref<1x128xf32, #tpu.memory_space<vmem>>, vector<1x128xf32>
    %20 = vector.broadcast %19 : vector<1x128xf32> to vector<8x128xf32>
    %21 = arith.addf %18, %20 : vector<8x128xf32>
    %c0_13 = arith.constant 0 : index
    %c0_14 = arith.constant 0 : index
    %22 = vector.load %arg7[%c0_13, %c0_14] : memref<8x128xf32, #tpu.memory_space<vmem>>, vector<8x128xf32>
    tpu.vector_store %arg7[%c0_13, %c0_14], %7 {strides = array<i32>} : memref<8x128xf32, #tpu.memory_space<vmem>>, vector<8x128xf32>,
    %c0_15 = arith.constant 0 : index
    %c0_16 = arith.constant 0 : index
    %23 = vector.load %arg8[%c0_15, %c0_16] : memref<8x128xf32, #tpu.memory_space<vmem>>, vector<8x128xf32>
    tpu.vector_store %arg8[%c0_15, %c0_16], %8 {strides = array<i32>} : memref<8x128xf32, #tpu.memory_space<vmem>>, vector<8x128xf32>,
    %24 = arith.truncf %21 : vector<8x128xf32> to vector<8x128xbf16>
    %c0_17 = arith.constant 0 : index
    %c0_18 = arith.constant 0 : index
    %25 = vector.load %arg9[%c0_17, %c0_18] : memref<8x128xbf16, #tpu.memory_space<vmem>>, vector<8x128xbf16>
    tpu.vector_store %arg9[%c0_17, %c0_18], %24 {strides = array<i32>} : memref<8x128xbf16, #tpu.memory_space<vmem>>, vector<8x128xbf16>,
    return
  }
  func.func @transform_0(%arg0: i32) -> (i32, i32) {
    %c0_i32 = arith.constant 0 : i32
    %c0_i32_0 = arith.constant 0 : i32
    return %arg0, %c0_i32 : i32, i32
  }
  func.func @transform_1(%arg0: i32) -> (i32, i32) {
    %c0_i32 = arith.constant 0 : i32
    %c0_i32_0 = arith.constant 0 : i32
    %c0_i32_1 = arith.constant 0 : i32
    return %c0_i32, %c0_i32_0 : i32, i32
  }
  func.func @transform_2(%arg0: i32) -> (i32, i32) {
    %c0_i32 = arith.constant 0 : i32
    %c0_i32_0 = arith.constant 0 : i32
    %c0_i32_1 = arith.constant 0 : i32
    return %c0_i32, %c0_i32_0 : i32, i32
  }
  func.func @transform_3(%arg0: i32) -> (i32, i32) {
    %c0_i32 = arith.constant 0 : i32
    %c0_i32_0 = arith.constant 0 : i32
    %c0_i32_1 = arith.constant 0 : i32
    return %c0_i32, %c0_i32_0 : i32, i32
  }
  func.func @transform_4(%arg0: i32) -> (i32, i32) {
    %c0_i32 = arith.constant 0 : i32
    %c0_i32_0 = arith.constant 0 : i32
    %c0_i32_1 = arith.constant 0 : i32
    return %c0_i32, %c0_i32_0 : i32, i32
  }
  func.func @transform_5(%arg0: i32) -> (i32, i32) {
    %c0_i32 = arith.constant 0 : i32
    %c0_i32_0 = arith.constant 0 : i32
    return %arg0, %c0_i32 : i32, i32
  }
  func.func @transform_6(%arg0: i32) -> (i32, i32) {
    %c0_i32 = arith.constant 0 : i32
    %c0_i32_0 = arith.constant 0 : i32
    return %arg0, %c0_i32 : i32, i32
  }
  func.func @transform_7(%arg0: i32) -> (i32, i32) {
    %c0_i32 = arith.constant 0 : i32
    %c0_i32_0 = arith.constant 0 : i32
    return %arg0, %c0_i32 : i32, i32
  }
  func.func @transform_8(%arg0: i32) -> (i32, i32) {
    %c0_i32 = arith.constant 0 : i32
    %c0_i32_0 = arith.constant 0 : i32
    return %arg0, %c0_i32 : i32, i32
  }
}

</mosaic_0001>

<bundles_post_ra>
// kernel: tpu_custom_call.1
= control target key start
LH: loop header
LB: loop body
LE: loop exit
PB: predicated region body
PF: predicated region fallthrough
CT: control target
= control target key end

     0   :  { %14 = vsyncpa [#allocation3], 0  ;;  %s668_s0 = inlined_call_operand.hbm [shape: f32[8,32], index: 0, kind: input, shape index: {}]   ;;  %s669_s1 = inlined_call_operand.hbm [shape: bf16[32,256], index: 1, kind: input, shape index: {}]   ;;  %s670_s2 = inlined_call_operand.vmem [shape: f32[1,256], index: 2, kind: input, shape index: {}]   ;;  %s671_s3 = inlined_call_operand.hbm [shape: bf16[128,128], index: 3, kind: input, shape index: {}]   ;;  %s672_s4 = inlined_call_operand.vmem [shape: f32[1,128], index: 4, kind: input, shape index: {}]   ;;  %s673_s5 = inlined_call_operand.vmem [shape: bf16[8,128], index: 5, kind: input, shape index: {}]   ;;  %s674_s6 = inlined_call_operand.hbm [shape: f32[8,128], index: 6, kind: output, shape index: {0}]   ;;  %s675_s7 = inlined_call_operand.hbm [shape: f32[8,128], index: 7, kind: output, shape index: {1}]   ;;  %s676_s8 = inlined_call_operand.hbm [shape: bf16[8,128], index: 8, kind: output, shape index: {2}]  }
   0x1   :  { %15 = vsyncpa [#allocation6], 0 }
   0x2   :  { %16 = vsyncpa [#allocation4], 0 }
   0x3   :  { %17 = vsyncpa [#allocation10], 0  ;;  %s529_s27 = smov [#allocation5]   ;;  %s389_s9 = scalar_lea.hbm %s669_s1, 512 }
   0x4   :  { %s33_s28 = sshll.u32 %s529_s27, 4  ;;  %p390_p0 = scmp.ne.s32.totalorder %s669_s1, %s389_s9  ;;  %s34_s28 = int_to_ptr.vmem [resolvable:$true] %s33_s28 }
   0x5   :  { %p393_p1 = scmp.lt.u32.totalorder %s389_s9, %s669_s1 }
   0x7   :  { %p395_p2 = pnand %p393_p1, %p390_p0 }
   0x9   :  { %398 = shalt.err (!%p395_p2)
}
   0xa   :  { %s399_s14 = scalar_lea.vmem %s34_s28, 512  ;;  %p404_p4 = scmp.lt.s32.totalorder %s34_s28, %s34_s28 }
   0xb   :  { %p400_p3 = scmp.ne.s32.totalorder %s34_s28, %s399_s14  ;;  %p405_p5 = scmp.lt.s32.totalorder %s399_s14, %s399_s14 }
   0xd   :  { %p406_p6 = por %p405_p5, %p404_p4 }
   0xf   :  { %p407_p7 = pnand %p406_p6, %p400_p3 }
  0x11   :  { %410 = shalt.err (!%p407_p7)
}
  0x12   :  { %s530_s15 = smov 128   ;;  %s531_s16 = smov 8  }
  0x13   :  { %39 = dma.hbm_to_vmem [thread:$0]  %s669_s1, 512, %s34_s28, [#allocation6], %s530_s15, %s530_s15, %s531_s16  }
  0x14   :  { %s532_s19 = smov [#allocation2]   ;;  %s533_s21 = smov [#allocation7]  }
  0x15   :  { %s24_s20 = sshll.u32 %s532_s19, 4  ;;  %s47_s22 = sshll.u32 %s533_s21, 4  ;;  %s25_s20 = int_to_ptr.vmem [resolvable:$true] %s24_s20  ;;  %s48_s22 = int_to_ptr.vmem [resolvable:$true] %s47_s22 }
  0x16   :  { %s411_s25 = scalar_lea.hbm %s668_s0, 128 }
  0x17   :  { %p412_p8 = scmp.ne.s32.totalorder %s668_s0, %s411_s25  ;;  %p415_p9 = scmp.lt.u32.totalorder %s411_s25, %s668_s0 }
  0x19   :  { %p417_p10 = pnand %p415_p9, %p412_p8 }
  0x1b   :  { %420 = shalt.err (!%p417_p10)
}
  0x1c   :  { %s421_s1 = scalar_lea.vmem %s25_s20, 128  ;;  %p426_p12 = scmp.lt.s32.totalorder %s25_s20, %s25_s20 }
  0x1d   :  { %p422_p11 = scmp.ne.s32.totalorder %s25_s20, %s421_s1  ;;  %p427_p13 = scmp.lt.s32.totalorder %s421_s1, %s421_s1 }
  0x1f   :  { %p428_p0 = por %p427_p13, %p426_p12 }
  0x21   :  { %p429_p1 = pnand %p428_p0, %p422_p11 }
  0x23   :  { %432 = shalt.err (!%p429_p1)
}
  0x24   :  { %27 = dma.hbm_to_vmem [thread:$0]  %s668_s0, 128, %s25_s20, [#allocation3]  }
  0x25   :  { %s433_s12 = scalar_lea.hbm %s671_s3, 1024 }
  0x26   :  { %p434_p2 = scmp.ne.s32.totalorder %s671_s3, %s433_s12  ;;  %p437_p3 = scmp.lt.u32.totalorder %s433_s12, %s671_s3 }
  0x28   :  { %p439_p4 = pnand %p437_p3, %p434_p2 }
  0x2a   :  { %442 = shalt.err (!%p439_p4)
}
  0x2b   :  { %s443_s17 = scalar_lea.vmem %s48_s22, 1024  ;;  %p448_p6 = scmp.lt.s32.totalorder %s48_s22, %s48_s22 }
  0x2c   :  { %p444_p5 = scmp.ne.s32.totalorder %s48_s22, %s443_s17  ;;  %p449_p7 = scmp.lt.s32.totalorder %s443_s17, %s443_s17 }
  0x2e   :  { %p450_p8 = por %p449_p7, %p448_p6 }
  0x30   :  { %p451_p9 = pnand %p450_p8, %p444_p5 }
  0x32   :  { %454 = shalt.err (!%p451_p9)
}
  0x33   :  { %s534_s0 = smov 64   ;;  %s535_s18 = smov 4  }
  0x34   :  { %53 = dma.hbm_to_vmem [thread:$0]  %s671_s3, 1024, %s48_s22, [#allocation6], %s534_s0, %s534_s0, %s535_s18  }
  0x35   :  { %521 = dma.done.wait [#allocation3], 128  }
  0x36   :  { %522 = vsyncadd [#allocation3], 4294967168 }
  0x37   :  { %523 = dma.done.wait [#allocation6], 1536  }
  0x38   :  { %524 = vsyncadd [#allocation6], 4294965760  ;;  %v536_v0 = vmov 0   ;;  %v537_v1 = vmov 0.0   ;;  %v373_v2 = vld [vmem:[#allocation5 + $0x4] ss:$8 sps:$4 sm:$0xff]   ;;  %v76_v16 = vlaneseq }
  0x39   :  { %142 = vmatprep.mubr.bf16.mxu0 %v536_v0  ;;  %340 = vmatprep.subr.bf16.mxu1 %v537_v1  ;;  %v375_v3 = vld [vmem:[#allocation5] ss:$8 sps:$4 sm:$0xff]   ;;  %v376_v4 = vld [vmem:[#allocation5 + $0x14] ss:$8 sps:$4 sm:$0xff]   ;;  %v378_v5 = vld [vmem:[#allocation5 + $0x10] ss:$8 sps:$4 sm:$0xff]  }
  0x3a   :  { %110 = vmatprep.subr.bf16.mxu0 %v373_v2  ;;  %v68_v6 = vld [vmem:[#allocation2] sm:$0xff]  ;;  %v379_v7 = vld [vmem:[#allocation7] sm:$0xff]   ;;  %vm106_vm0 = vcmask 261120   ;;  %v380_v8 = vld [vmem:[#allocation7 + $0x8] sm:$0xff]   ;;  %vm538_vm1 = vmmov 0   ;;  %v77_v17 = vshrl.u32 %v76_v16, 7 }
  0x3b   :  { %111 = vmatpush1.bf16.msra.mxu0 %v375_v3  ;;  %341 = vmatpush3.bf16.msra.mxu1 %v379_v7  ;;  %v69_v9 = vpack.c.bf16 %v68_v6, %v68_v6  ;;  %v381_v10 = vld [vmem:[#allocation7 + $0x10] sm:$0xff]   ;;  %v382_v11 = vld [vmem:[#allocation7 + $0x18] sm:$0xff]   ;;  %v383_v12 = vld [vmem:[#allocation7 + $0x20] sm:$0xff]   ;;  %s540_s25 = smov [#allocation8]  }
  0x3c   :  { %112 = vmatprep.subr.bf16.mxu0 %v376_v4  ;;  %342 = vmatprep.subr.bf16.mxu1 %v537_v1  ;;  %v384_v13 = vld [vmem:[#allocation7 + $0x28] sm:$0xff]   ;;  %v385_v14 = vld [vmem:[#allocation7 + $0x30] sm:$0xff]   ;;  %v386_v15 = vld [vmem:[#allocation7 + $0x38] sm:$0xff]   ;;  %v78_v18 = vsub.s32 0, %v77_v17  ;;  %v82_v20 = vsub.s32 1, %v77_v17  ;;  %s280_s26 = sshll.u32 %s540_s25, 4  ;;  %s281_s26 = int_to_ptr.vmem [resolvable:$true] %s280_s26 }
  0x3d   :  { %356 = vmatprep.mubr.msk.bf16.mxu1 %vm538_vm1, %v537_v1  ;;  %v74_v19 = vld [vmem:[%s670_s2] sm:$0x3]  ;;  %s539_s2 = smov [#allocation9]  }
  0x3e   :  { %v79_v21 = vrot.slane %v74_v19, %v78_v18  ;;  %v83_v22 = vrot.slane %v74_v19, %v82_v20  ;;  %v154_v31 = vld [vmem:[%s673_s5] sm:$0xf]  ;;  %s290_s24 = sshll.u32 %s539_s2, 4  ;;  %s291_s24 = int_to_ptr.vmem [resolvable:$true] %s290_s24 }
  0x3f   :  { %113 = vmatpush1.bf16.msra.mxu0 %v378_v5  ;;  %343 = vmatpush3.bf16.msra.mxu1 %v380_v8  ;;  %v155_v32 = vunpack.c.l.bf16 %v154_v31  ;;  %s455_s27 = scalar_lea.vmem %s291_s24, 128  ;;  %p460_p11 = scmp.lt.s32.totalorder %s291_s24, %s291_s24 }
  0x40   :  { %344 = vmatprep.subr.bf16.mxu1 %v537_v1  ;;  %p456_p10 = scmp.ne.s32.totalorder %s291_s24, %s455_s27  ;;  %p461_p12 = scmp.lt.s32.totalorder %s455_s27, %s455_s27 }
  0x42   :  { %321 = vmatmul.mubr.msk.bf16.vlgmr.msra.gmra.mrb[0].mxu0 %vm106_vm0, %v69_v9  ;;  %p462_p13 = por %p461_p12, %p460_p11 }
  0x43   :  { %345 = vmatpush3.bf16.msra.mxu1 %v381_v10 }
  0x44   :  { %346 = vmatprep.subr.bf16.mxu1 %v537_v1  ;;  %p463_p0 = pnand %p462_p13, %p456_p10 }
  0x47   :  { %347 = vmatpush3.bf16.msra.mxu1 %v382_v11 }
  0x48   :  { %348 = vmatprep.subr.bf16.mxu1 %v537_v1 }
  0x4b   :  { %349 = vmatpush3.bf16.msra.mxu1 %v383_v12 }
  0x4c   :  { %350 = vmatprep.subr.bf16.mxu1 %v537_v1 }
  0x4f   :  { %351 = vmatpush3.bf16.msra.mxu1 %v384_v13 }
  0x50   :  { %352 = vmatprep.subr.bf16.mxu1 %v537_v1 }
  0x53   :  { %353 = vmatpush3.bf16.msra.mxu1 %v385_v14 }
  0x54   :  { %354 = vmatprep.subr.bf16.mxu1 %v537_v1 }
  0x57   :  { %355 = vmatpush3.bf16.msra.mxu1 %v386_v15 }
 0x115   :  { %v144_v23 = vpop.f32.mrb[0].mxu0 }
 0x116   :  { %v145_v24 = vadd.f32 %v144_v23, %v79_v21  ;;  %v146_v25 = vpop.f32.mrb[1].mxu0 }
 0x117   :  { %v147_v26 = vadd.f32 %v146_v25, %v83_v22  ;;  %v148_v27 = vpop.f32.mrb[2].mxu0 }
 0x118   :  { %270 = vst [vmem:[#allocation8] sm:$0xff] %v145_v24  ;;  %v149_v28 = vpop.f32.mrb[3].mxu0 }
 0x119   :  { %v151_v29 = vmul.f32 0.5, %v147_v26  ;;  %271 = vst [vmem:[#allocation9] sm:$0xff] %v147_v26 }
 0x11b   :  { %v152_v30 = vmul.f32 1.442695, %v151_v29 }
 0x11d   :  { %387 = vpow2.f32 %v152_v30 }
 0x127   :  { %v388_v33 = vpop.eup %387 }
 0x128   :  { %v156_v34 = vmul.f32 %v388_v33, %v155_v32 }
 0x12a   :  { %v157_v35 = vadd.f32 %v156_v34, %v145_v24 }
 0x12c   :  { %v158_v36 = vpack.c.bf16 %v157_v35, %v157_v35 }
 0x12e   :  { %357 = vmatmul.mubr.bf16.vlgmr.msra.gmra.mrb[0].mxu1 %v158_v36 }
 0x12f   :  { %466 = shalt.err (!%p463_p0)
}
 0x130   :  { %s467_s30 = scalar_lea.hbm %s675_s7, 128 }
 0x131   :  { %p468_p1 = scmp.ne.s32.totalorder %s675_s7, %s467_s30  ;;  %p471_p2 = scmp.lt.u32.totalorder %s467_s30, %s675_s7 }
 0x133   :  { %p473_p3 = pnand %p471_p2, %p468_p1 }
 0x135   :  { %476 = shalt.err (!%p473_p3)
}
 0x136   :  { %293 = dma.vmem_to_hbm [thread:$0]  %s291_s24, 128, %s675_s7, [#allocation10]  }
 0x137   :  { %s477_s13 = scalar_lea.vmem %s281_s26, 128  ;;  %p482_p5 = scmp.lt.s32.totalorder %s281_s26, %s281_s26 }
 0x138   :  { %p478_p4 = scmp.ne.s32.totalorder %s281_s26, %s477_s13  ;;  %p483_p6 = scmp.lt.s32.totalorder %s477_s13, %s477_s13 }
 0x13a   :  { %p484_p7 = por %p483_p6, %p482_p5 }
 0x13c   :  { %p485_p8 = pnand %p484_p7, %p478_p4 }
 0x13e   :  { %488 = shalt.err (!%p485_p8)
}
 0x13f   :  { %s489_s16 = scalar_lea.hbm %s674_s6, 128 }
 0x140   :  { %p490_p9 = scmp.ne.s32.totalorder %s674_s6, %s489_s16  ;;  %p493_p10 = scmp.lt.u32.totalorder %s489_s16, %s674_s6 }
 0x142   :  { %p495_p11 = pnand %p493_p10, %p490_p9 }
 0x144   :  { %498 = shalt.err (!%p495_p11)
}
 0x145   :  { %283 = dma.vmem_to_hbm [thread:$0]  %s281_s26, 128, %s674_s6, [#allocation4]   ;;  %v322_v37 = vld [vmem:[%s672_s4] ss:$0 sm:$0xff] }
 0x146   :  { %s541_s22 = smov [#allocation11]  }
 0x147   :  { %s300_s23 = sshll.u32 %s541_s22, 4  ;;  %s301_s23 = int_to_ptr.vmem [resolvable:$true] %s300_s23 }
 0x148   :  { %s499_s2 = scalar_lea.vmem %s301_s23, 64  ;;  %p504_p13 = scmp.lt.s32.totalorder %s301_s23, %s301_s23 }
 0x149   :  { %p500_p12 = scmp.ne.s32.totalorder %s301_s23, %s499_s2  ;;  %p505_p0 = scmp.lt.s32.totalorder %s499_s2, %s499_s2 }
 0x14b   :  { %p506_p1 = por %p505_p0, %p504_p13 }
 0x14d   :  { %p507_p2 = pnand %p506_p1, %p500_p12 }
 0x201   :  { %v264_v38 = vpop.f32.mrb[0].mxu1 }
 0x202   :  { %v265_v39 = vadd.f32 %v322_v37, %v264_v38  ;;  %v358_v40 = vpop.f32.mrb[1].mxu1 }
 0x203   :  { %v267_v41 = vpop.f32.mrb[2].mxu1 }
 0x204   :  { %v272_v42 = vpack.c.bf16 %v265_v39, %v265_v39  ;;  %v359_v43 = vpop.f32.mrb[3].mxu1 }
 0x206   :  { %273 = vst [vmem:[#allocation11] sm:$0xf] %v272_v42 }
 0x207   :  { %510 = shalt.err (!%p507_p2)
}
 0x208   :  { %s511_s4 = scalar_lea.hbm %s676_s8, 64 }
 0x209   :  { %p512_p3 = scmp.ne.s32.totalorder %s676_s8, %s511_s4  ;;  %p515_p4 = scmp.lt.u32.totalorder %s511_s4, %s676_s8 }
 0x20b   :  { %p517_p5 = pnand %p515_p4, %p512_p3 }
 0x20d   :  { %520 = shalt.err (!%p517_p5)
}
 0x20e   :  { %303 = dma.vmem_to_hbm [thread:$0]  %s301_s23, 64, %s676_s8, [#allocation10]  }
 0x20f   :  { %525 = dma.done.wait [#allocation4], 128  }
 0x210   :  { %526 = vsyncadd [#allocation4], 4294967168 }
 0x211   :  { %527 = dma.done.wait [#allocation10], 192  }
 0x212   :  { %528 = vsyncadd [#allocation10], 4294967104 }
 0x213   :  { %313 = vsyncpa [#allocation3], 1 }
 0x214   :  { %314 = vsyncpa [#allocation6], 1 }
 0x215   :  { %315 = vsyncpa [#allocation4], 1 }
 0x216   :  { %316 = vsyncpa [#allocation10], 1 }

</bundles_post_ra>
